<compile_context>
chip_gen: v5e
topology: v5e:2x2
jax: 0.10.0
libtpu: 0.0.40
codegen_flags: <defaults>
</compile_context>

<pallas_src>
import functools

import jax
import jax.numpy as jnp
from jax.experimental import pallas as pl
from jax.experimental.pallas import tpu as pltpu

THRESHOLD = 0.5
# Clamp before log so x == 0 (conj path) or x == 1 (disj path) gives a large
# negative log instead of -inf (which would produce NaN via -inf * 0 against a
# zero weight inside the dot). exp() then underflows to the correct 0.
_TINY = 1e-30


def _round_up(n, m):
    return ((n + m - 1) // m) * m


def union_layer_kernel(x_ref, bwc_ref, bwd_ref, out_ref, *, units_padded):
    """Fused log (EUP, f32) -> bf16 MXU matmul (f32 acc) -> exp -> slice stores."""
    x = x_ref[...].astype(jnp.float32)                                 # (TB, I)

    # Logs in f32 on the EUP; cast to bf16 only as MXU operands.  The weights
    # are exactly {0,1} in bf16, so per-term products are exact and the only
    # error is the bf16 rounding of the log values (<= 2^-9 relative).
    logx = jnp.log(jnp.maximum(x, _TINY)).astype(jnp.bfloat16)
    log1mx = jnp.log(jnp.maximum(1.0 - x, _TINY)).astype(jnp.bfloat16)

    conj = jnp.exp(jnp.dot(logx, bwc_ref[...],
                           preferred_element_type=jnp.float32))        # (TB, Up)
    disj = 1.0 - jnp.exp(jnp.dot(log1mx, bwd_ref[...],
                                 preferred_element_type=jnp.float32))  # (TB, Up)

    # Two lane-aligned slice stores (units_padded % 128 == 0): no concat temp,
    # unmasked full-lane vst.
    out_ref[:, :units_padded] = conj.astype(out_ref.dtype)
    out_ref[:, units_padded:] = disj.astype(out_ref.dtype)


def union_layer_forward(x, w_conj, w_disj, *, batch_tile=256,
                        vmem_budget_bytes=10 * 1024 * 1024):
    """Pallas wrapper: batch-tiled 1-D 'parallel' grid, lane-padded U, resident weights."""
    B, I = x.shape
    U = w_conj.shape[1]
    Up = _round_up(U, 128)          # lane-dense MXU N / output columns

    # Binarize ONCE outside the grid loop (Binarize.apply(w - 0.5) == w > 0.5),
    # directly in bf16 ({0,1} exact), and zero-pad the columns to Up.
    # Padded columns are harmless: conj = exp(0) = 1, disj = 1 - exp(0) = 0.
    bwc = jnp.pad((w_conj > THRESHOLD).astype(jnp.bfloat16), ((0, 0), (0, Up - U)))
    bwd = jnp.pad((w_disj > THRESHOLD).astype(jnp.bfloat16), ((0, 0), (0, Up - U)))

    out_dtype = x.dtype
    x_bytes = jnp.dtype(x.dtype).itemsize
    o_bytes = jnp.dtype(out_dtype).itemsize

    def vmem_estimate(tb):
        xin = 2 * tb * I * x_bytes                    # double-buffered x stream
        w = 2 * (I * Up * 2)                          # two single-buffered bf16 weight blocks
        oout = 2 * tb * 2 * Up * o_bytes              # double-buffered output stream
        tmp = tb * (2 * I * 2 + 2 * Up * 4 + I * 4)   # bf16 log operands + f32 temps
        return xin + w + oout + tmp

    # Batch tile: multiple of 8 sublanes, capped by batch_tile and by the VMEM budget.
    tb_cap = max(8, _round_up(min(batch_tile, _round_up(B, 8)), 8))
    while vmem_estimate(tb_cap) > vmem_budget_bytes and tb_cap > 8:
        tb_cap = max(8, tb_cap // 2)

    # >= 2 grid steps whenever B allows, so the 'parallel' axis feeds both v7x TCs.
    min_tiles = 2 if B >= 16 else 1
    ntiles = max(pl.cdiv(B, tb_cap), min_tiles)
    tb = _round_up(pl.cdiv(B, ntiles), 8)
    Bp = ntiles * tb
    if Bp != B:
        # Zero rows -> log(tiny)/log(1): finite garbage rows, sliced off below.
        x = jnp.pad(x, ((0, Bp - B), (0, 0)))

    cost = pl.CostEstimate(
        flops=2 * 2 * Bp * I * Up,                       # two (Bp,I)@(I,Up) matmuls
        transcendentals=Bp * (2 * I + 2 * Up),           # 2 logs per input, 2 exps per output
        bytes_accessed=Bp * I * x_bytes + 2 * I * Up * 2 + Bp * 2 * Up * o_bytes,
    )

    out = pl.pallas_call(
        functools.partial(union_layer_kernel, units_padded=Up),
        out_shape=jax.ShapeDtypeStruct((Bp, 2 * Up), out_dtype),
        grid_spec=pltpu.PrefetchScalarGridSpec(
            num_scalar_prefetch=0,
            grid=(ntiles,),
            in_specs=[
                pl.BlockSpec((tb, I), lambda b: (b, 0)),
                # Constant-index weight blocks: single-buffered, VMEM-resident.
                pl.BlockSpec((I, Up), lambda b: (0, 0), pipeline_mode=pl.Buffered(1)),
                pl.BlockSpec((I, Up), lambda b: (0, 0), pipeline_mode=pl.Buffered(1)),
            ],
            out_specs=pl.BlockSpec((tb, 2 * Up), lambda b: (b, 0)),
        ),
        compiler_params=pltpu.CompilerParams(
            dimension_semantics=("parallel",)),
        cost_estimate=cost,
    )(x, bwc, bwd)

    # Drop padded rows and padded weight columns; restore [conj | disj] layout.
    return jnp.concatenate([out[:B, :U], out[:B, Up:Up + U]], axis=1)


def union_layer_ref(x, w_conj, w_disj):
    """Pure-JAX f32 reference mirroring the PyTorch forward values."""
    bwc = (w_conj > THRESHOLD).astype(jnp.float32)
    bwd = (w_disj > THRESHOLD).astype(jnp.float32)
    conj = jnp.prod(1.0 - (1.0 - x)[:, :, None] * bwc[None, :, :], axis=1)
    disj = 1.0 - jnp.prod(1.0 - x[:, :, None] * bwd[None, :, :], axis=1)
    return jnp.concatenate([conj, disj], axis=1)


if __name__ == "__main__":
    # Small shapes consistent with the module: batch=8, input_shape=32, units=16.
    B, I, U = 8, 32, 16

    key = jax.random.PRNGKey(0)
    kx, kc, kd = jax.random.split(key, 3)

    # RRL inputs live in [0, 1]; weights are clipped to [0, 1] during training —
    # draw uniform [0, 1] so the binarization (w > 0.5) is non-trivial.
    x = jax.random.uniform(kx, (B, I), dtype=jnp.float32)
    w_conj = jax.random.uniform(kc, (I, U), dtype=jnp.float32)
    w_disj = jax.random.uniform(kd, (I, U), dtype=jnp.float32)

    out = union_layer_forward(x, w_conj, w_disj)
    out = jax.block_until_ready(out)

    ref = union_layer_ref(x, w_conj, w_disj)
    assert out.shape == (B, 2 * U)
    # bf16 MXU operands: worst-case abs error <= max_p p*(-ln p)*2^-9 ~= 7e-4
    # (weights {0,1} exact in bf16; only the logs are rounded). 3e-3 is ample.
    assert jnp.allclose(out, ref, atol=3e-3, rtol=1e-3), "mismatch vs reference"

    print("KERNEL_OK")
</pallas_src>

<mosaic_0001>
module attributes {stable_mosaic.version = 11 : i64} {
  func.func @union_layer_kernel(%arg0: i32, %arg1: memref<8x32xf32, #tpu.memory_space<vmem>>, %arg2: memref<32x128xbf16, #tpu.memory_space<vmem>>, %arg3: memref<32x128xbf16, #tpu.memory_space<vmem>>, %arg4: memref<8x256xf32, #tpu.memory_space<vmem>>) attributes {dimension_semantics = [#tpu.dimension_semantics<parallel>], iteration_bounds = array<i64: 1>, scalar_prefetch = 0 : i64, scratch_operands = 0 : i64, tpu.core_type = #tpu.core_type<tc>, window_params = [{transform_indices = @transform_0, window_bounds = array<i64: 8, 32>}, {pipeline_mode = #tpu.pipeline_mode<synchronous>, transform_indices = @transform_1, window_bounds = array<i64: 32, 128>}, {pipeline_mode = #tpu.pipeline_mode<synchronous>, transform_indices = @transform_2, window_bounds = array<i64: 32, 128>}, {transform_indices = @transform_3, window_bounds = array<i64: 8, 256>}]} {
    %c0 = arith.constant 0 : index
    %c0_0 = arith.constant 0 : index
    %0 = vector.load %arg1[%c0, %c0_0] : memref<8x32xf32, #tpu.memory_space<vmem>>, vector<8x32xf32>
    %cst = arith.constant 1.000000e-30 : f32
    %1 = vector.broadcast %cst : f32 to vector<8x32xf32>
    %2 = arith.maximumf %0, %1 : vector<8x32xf32>
    %3 = math.log %2 : vector<8x32xf32>
    %4 = arith.truncf %3 : vector<8x32xf32> to vector<8x32xbf16>
    %cst_1 = arith.constant 1.000000e+00 : f32
    %5 = vector.broadcast %cst_1 : f32 to vector<8x32xf32>
    %6 = arith.subf %5, %0 : vector<8x32xf32>
    %cst_2 = arith.constant 1.000000e-30 : f32
    %7 = vector.broadcast %cst_2 : f32 to vector<8x32xf32>
    %8 = arith.maximumf %6, %7 : vector<8x32xf32>
    %9 = math.log %8 : vector<8x32xf32>
    %10 = arith.truncf %9 : vector<8x32xf32> to vector<8x32xbf16>
    %c0_3 = arith.constant 0 : index
    %c0_4 = arith.constant 0 : index
    %11 = vector.load %arg2[%c0_3, %c0_4] : memref<32x128xbf16, #tpu.memory_space<vmem>>, vector<32x128xbf16>
    %cst_5 = arith.constant dense<0.000000e+00> : vector<8x128xf32>
    %12 = tpu.matmul %4, %11, %cst_5 {dimension_numbers = #tpu.dot_dimension_numbers<[1], [0], [0], [1], [0, 0, 1, 1], [], []>} : vector<8x32xbf16>, vector<32x128xbf16>, vector<8x128xf32> -> vector<8x128xf32>
    %13 = math.exp %12 : vector<8x128xf32>
    %c0_6 = arith.constant 0 : index
    %c0_7 = arith.constant 0 : index
    %14 = vector.load %arg3[%c0_6, %c0_7] : memref<32x128xbf16, #tpu.memory_space<vmem>>, vector<32x128xbf16>
    %cst_8 = arith.constant dense<0.000000e+00> : vector<8x128xf32>
    %15 = tpu.matmul %10, %14, %cst_8 {dimension_numbers = #tpu.dot_dimension_numbers<[1], [0], [0], [1], [0, 0, 1, 1], [], []>} : vector<8x32xbf16>, vector<32x128xbf16>, vector<8x128xf32> -> vector<8x128xf32>
    %16 = math.exp %15 : vector<8x128xf32>
    %cst_9 = arith.constant 1.000000e+00 : f32
    %17 = vector.broadcast %cst_9 : f32 to vector<8x128xf32>
    %18 = arith.subf %17, %16 : vector<8x128xf32>
    %c0_10 = arith.constant 0 : index
    %c0_11 = arith.constant 0 : index
    %19 = vector.load %arg4[%c0_10, %c0_11] : memref<8x256xf32, #tpu.memory_space<vmem>>, vector<8x128xf32>
    tpu.vector_store %arg4[%c0_10, %c0_11], %13 {strides = array<i32>} : memref<8x256xf32, #tpu.memory_space<vmem>>, vector<8x128xf32>,
    %c0_12 = arith.constant 0 : index
    %c128 = arith.constant 128 : index
    %20 = vector.load %arg4[%c0_12, %c128] : memref<8x256xf32, #tpu.memory_space<vmem>>, vector<8x128xf32>
    tpu.vector_store %arg4[%c0_12, %c128], %18 {strides = array<i32>} : memref<8x256xf32, #tpu.memory_space<vmem>>, vector<8x128xf32>,
    return
  }
  func.func @transform_0(%arg0: i32) -> (i32, i32) {
    %c0_i32 = arith.constant 0 : i32
    %c0_i32_0 = arith.constant 0 : i32
    return %arg0, %c0_i32 : i32, i32
  }
  func.func @transform_1(%arg0: i32) -> (i32, i32) {
    %c0_i32 = arith.constant 0 : i32
    %c0_i32_0 = arith.constant 0 : i32
    %c0_i32_1 = arith.constant 0 : i32
    return %c0_i32, %c0_i32_0 : i32, i32
  }
  func.func @transform_2(%arg0: i32) -> (i32, i32) {
    %c0_i32 = arith.constant 0 : i32
    %c0_i32_0 = arith.constant 0 : i32
    %c0_i32_1 = arith.constant 0 : i32
    return %c0_i32, %c0_i32_0 : i32, i32
  }
  func.func @transform_3(%arg0: i32) -> (i32, i32) {
    %c0_i32 = arith.constant 0 : i32
    %c0_i32_0 = arith.constant 0 : i32
    return %arg0, %c0_i32 : i32, i32
  }
}

</mosaic_0001>

<bundles_post_ra>
// kernel: tpu_custom_call.1
= control target key start
LH: loop header
LB: loop body
LE: loop exit
PB: predicated region body
PF: predicated region fallthrough
CT: control target
= control target key end

     0   :  { %8 = vsyncpa [#allocation3], 0  ;;  %s337_s0 = inlined_call_operand.hbm [shape: f32[8,32], index: 0, kind: input, shape index: {}]   ;;  %s338_s1 = inlined_call_operand.hbm [shape: bf16[32,128], index: 1, kind: input, shape index: {}]   ;;  %s339_s2 = inlined_call_operand.hbm [shape: bf16[32,128], index: 2, kind: input, shape index: {}]   ;;  %s340_s3 = inlined_call_operand.hbm [shape: f32[8,256], index: 3, kind: output, shape index: {}]  }
   0x1   :  { %9 = vsyncpa [#allocation6], 0  ;;  %s26_s14 = sshll.u32 %s338_s1, 4  ;;  %s27_s14 = int_to_ptr.hbm [resolvable:$true] %s26_s14 }
   0x2   :  { %10 = vsyncpa [#allocation4], 0  ;;  %s299_s15 = smov [#allocation5]   ;;  %s16_s19 = sshll.u32 %s337_s0, 4  ;;  %s17_s19 = int_to_ptr.hbm [resolvable:$true] %s16_s19 }
   0x3   :  { %s28_s16 = sshll.u32 %s299_s15, 4  ;;  %s300_s20 = smov 64   ;;  %s29_s16 = int_to_ptr.vmem [resolvable:$true] %s28_s16 }
   0x4   :  { %s301_s21 = smov 4   ;;  %s302_s22 = smov [#allocation2]  }
   0x5   :  { %34 = dma.hbm_to_vmem [thread:$0]  %s27_s14, 256, %s29_s16, [#allocation6], %s300_s20, %s300_s20, %s301_s21  }
   0x6   :  { %s18_s23 = sshll.u32 %s302_s22, 4  ;;  %s39_s26 = sshll.u32 %s339_s2, 4  ;;  %s19_s23 = int_to_ptr.vmem [resolvable:$true] %s18_s23  ;;  %s40_s26 = int_to_ptr.hbm [resolvable:$true] %s39_s26 }
   0x7   :  { %21 = dma.hbm_to_vmem [thread:$0]  %s17_s19, 128, %s19_s23, [#allocation3]  }
   0x8   :  { %s303_s1 = smov [#allocation7]  }
   0x9   :  { %s41_s27 = sshll.u32 %s303_s1, 4  ;;  %s42_s27 = int_to_ptr.vmem [resolvable:$true] %s41_s27 }
   0xa   :  { %47 = dma.hbm_to_vmem [thread:$0]  %s40_s26, 256, %s42_s27, [#allocation6], %s300_s20, %s300_s20, %s301_s21  }
   0xb   :  { %293 = dma.done.wait [#allocation3], 128  }
   0xc   :  { %294 = vsyncadd [#allocation3], 4294967168 }
   0xd   :  { %295 = dma.done.wait [#allocation6], 512  }
   0xe   :  { %296 = vsyncadd [#allocation6], 4294966784  ;;  %v180_v0 = vld [vmem:[#allocation5 + $0x8] sm:$0xff]  ;;  %v182_v1 = vld [vmem:[#allocation7 + $0x8] sm:$0xff]  ;;  %vm87_vm0 = vcmask 261120   ;;  %s304_s0 = smov [#allocation8]  }
   0xf   :  { %v61_v2 = vld [vmem:[#allocation2] sm:$0xff]  ;;  %97 = vmatpush.bf16.msra.mxu0 %v180_v0  ;;  %131 = vmatpush.bf16.msra.mxu1 %v182_v1  ;;  %v179_v3 = vld [vmem:[#allocation5] sm:$0xff]  ;;  %v181_v4 = vld [vmem:[#allocation7] sm:$0xff]  ;;  %s148_s2 = sshll.u32 %s304_s0, 4  ;;  %s150_s30 = sshll.u32 %s340_s3, 4  ;;  %s149_s2 = int_to_ptr.vmem [resolvable:$true] %s148_s2  ;;  %s151_s30 = int_to_ptr.hbm [resolvable:$true] %s150_s30 }
  0x10   :  { %v62_v5 = vmax.f32 %v61_v2, 1e-30  ;;  %v66_v6 = vsub.f32 1.0, %v61_v2 }
  0x12   :  { %189 = vlog2.f32 %v62_v5  ;;  %v67_v7 = vmax.f32 %v66_v6, 1e-30 }
  0x13   :  { %98 = vmatpush.bf16.msra.mxu0 %v179_v3  ;;  %132 = vmatpush.bf16.msra.mxu1 %v181_v4 }
  0x14   :  { %191 = vlog2.f32 %v67_v7 }
  0x18   :  { %v190_v8 = vpop.eup %189 }
  0x19   :  { %v64_v9 = vmul.f32 0.6931472, %v190_v8 }
  0x1a   :  { %v192_v10 = vpop.eup %191 }
  0x1b   :  { %v65_v11 = vpack.c.bf16 %v64_v9, %v64_v9  ;;  %v69_v12 = vmul.f32 0.6931472, %v192_v10 }
  0x1d   :  { %169 = vmatmul.msk.bf16.vlgmr.msra.gmra.mxu0 %vm87_vm0, %v65_v11  ;;  %v70_v13 = vpack.c.bf16 %v69_v12, %v69_v12 }
  0x1f   :  { %178 = vmatmul.msk.bf16.vlgmr.msra.gmra.mxu1 %vm87_vm0, %v70_v13 }
  0x9a   :  { %v100_v14 = vpop.f32.mrf.mxu0 }
  0x9b   :  { %v104_v15 = vmul.f32 1.442695, %v100_v14 }
  0x9c   :  { %v134_v16 = vpop.f32.mrf.mxu1 }
  0x9d   :  { %193 = vpow2.f32 %v104_v15  ;;  %v138_v17 = vmul.f32 1.442695, %v134_v16 }
  0x9f   :  { %195 = vpow2.f32 %v138_v17 }
  0xa2   :  { %v102_v18 = vpop.f32.mrf.mxu0 }
  0xa3   :  { %v194_v19 = vpop.eup %193 }
  0xa4   :  { %141 = vst [vmem:[#allocation8] sm:$0xff] %v194_v19  ;;  %v136_v20 = vpop.f32.mrf.mxu1 }
  0xa5   :  { %v196_v21 = vpop.eup %195 }
  0xa6   :  { %v140_v22 = vsub.f32 1.0, %v196_v21 }
  0xa8   :  { %142 = vst [vmem:[#allocation8 + $0x8] sm:$0xff] %v140_v22 }
  0xa9   :  { %153 = dma.vmem_to_hbm [thread:$0]  %s149_s2, 256, %s151_s30, [#allocation4]  }
  0xaa   :  { %297 = dma.done.wait [#allocation4], 256  }
  0xab   :  { %298 = vsyncadd [#allocation4], 4294967040 }
  0xac   :  { %158 = vsyncpa [#allocation3], 1 }
  0xad   :  { %159 = vsyncpa [#allocation6], 1 }
  0xae   :  { %160 = vsyncpa [#allocation4], 1 }

</bundles_post_ra>
